<compile_context>
chip_gen: v5e
topology: v5e:2x2
jax: 0.10.0
libtpu: 0.0.40
codegen_flags: <defaults>
</compile_context>

<pallas_src>
import jax
import jax.numpy as jnp
from jax.experimental import pallas as pl
from jax.experimental.pallas import tpu as pltpu

D_MODEL = 128
HIDDEN = 64
N_OUT = 2
FUSED_H = 2 * HIDDEN      # 128: classifier-hidden || uncertainty-hidden
FUSED_O = 2 * N_OUT       # 4:   logits || uncertainty (pre-softplus)
LN_EPS = 1e-5             # PyTorch nn.LayerNorm default


def _round_up(x, m):
    return (x + m - 1) // m * m


def _choose_tile(n, tm_req):
    """Pick (row_tile, padded_row_count).

    Small inputs: one grid step with block == full (8-padded) array.
    Large inputs: tile is a multiple of 128 (keeps the transposed output block
    lane-dense) and small enough that the grid has >= ~4 steps.
    """
    n8 = _round_up(max(n, 1), 8)
    if n8 <= 512:
        return n8, n8
    tm = min(tm_req, _round_up(pl.cdiv(n8, 4), 128))
    tm = max(128, (tm // 128) * 128)
    return tm, _round_up(n8, tm)


def defect_classifier_kernel(x_ref, w1_ref, m_ref, vec_ref, w2_ref, out_ref):
    x = x_ref[...].astype(jnp.float32)                 # [TM, 128]

    vec = vec_ref[...]                                 # [8, 128] param slab
    b1 = vec[0:1, :]                                   # [1, 128]
    gamma = vec[1:2, :]                                # [1, 128]
    beta = vec[2:3, :]                                 # [1, 128]
    b2_col = vec[3:3 + FUSED_O, 0:1]                   # [4, 1] second-layer bias

    # ---- Fused first Linear of both branches: one 128x128 MXU matmul -------
    h = jnp.dot(x, w1_ref[...], preferred_element_type=jnp.float32) + b1

    # ---- Per-branch LayerNorm stats on the MXU ------------------------------
    # m_ref = blockdiag(ones(64,64))/64, so h @ M broadcasts each branch's
    # mean across that branch's 64 lanes (no cross-lane XLU reductions).
    mean_map = jnp.dot(h, m_ref[...], preferred_element_type=jnp.float32)
    centered = h - mean_map
    var_map = jnp.dot(centered * centered, m_ref[...],
                      preferred_element_type=jnp.float32)

    hn = centered * jax.lax.rsqrt(var_map + LN_EPS) * gamma + beta
    hn = jnp.maximum(hn, 0.0)                          # ReLU
    # Dropout(0.1): eval-mode identity.

    # ---- Fused second Linear (block-diagonal [128, 4]) ----------------------
    out4 = jnp.dot(hn, w2_ref[...], preferred_element_type=jnp.float32)  # [TM, 4]

    # ---- Lane-dense epilogue: transpose first, then bias + softplus ---------
    out_t = out4.T + b2_col                            # [4, TM]
    row = jax.lax.broadcasted_iota(jnp.int32, (FUSED_O, 1), 0)
    softplus = jnp.maximum(out_t, 0.0) + jnp.log1p(jnp.exp(-jnp.abs(out_t)))
    packed = jnp.where(row >= N_OUT, softplus + 1e-6, out_t)

    out_ref[...] = packed.astype(out_ref.dtype)        # unmasked full-lane store


def defect_classifier_forward(x, params, *, tm=2048):
    """x: [B, S, d_model] float32.  Returns (logits, uncertainty), each [B, S, 2]."""
    B, S, D = x.shape
    assert D == D_MODEL
    N = B * S

    tm, n_pad = _choose_tile(N, tm)

    x2d = x.reshape(N, D)
    if n_pad != N:
        x2d = jnp.pad(x2d, ((0, n_pad - N), (0, 0)))

    # ---- Build fused weights (pure layout plumbing, done once) -------------
    w1 = jnp.concatenate([params["w1c"], params["w1u"]], axis=1)       # [128, 128]

    lane = jnp.arange(FUSED_H)
    m_avg = ((lane[:, None] // HIDDEN) == (lane[None, :] // HIDDEN)
             ).astype(jnp.float32) / HIDDEN                             # [128, 128]

    slab = jnp.zeros((8, FUSED_H), jnp.float32)                         # [8, 128]
    slab = slab.at[0].set(
        jnp.concatenate([params["b1c"], params["b1u"]], axis=1).reshape(-1))
    slab = slab.at[1].set(
        jnp.concatenate([params["gc"], params["gu"]], axis=1).reshape(-1))
    slab = slab.at[2].set(
        jnp.concatenate([params["bc"], params["bu"]], axis=1).reshape(-1))
    b2_all = jnp.concatenate([params["b2c"].reshape(-1),
                              params["b2u"].reshape(-1)])                # [4]
    slab = slab.at[3:3 + FUSED_O, 0].set(b2_all)

    w2 = jnp.zeros((FUSED_H, FUSED_O), jnp.float32)
    w2 = w2.at[:HIDDEN, :N_OUT].set(params["w2c"])
    w2 = w2.at[HIDDEN:, N_OUT:].set(params["w2u"])                       # block-diag

    grid = (n_pad // tm,)
    const = lambda i: (0, 0)   # weights stay VMEM-resident across grid steps

    weight_bytes = 4 * (w1.size + m_avg.size + slab.size + w2.size)
    cost = pl.CostEstimate(
        flops=2 * n_pad * (D_MODEL * FUSED_H + 2 * FUSED_H * FUSED_H
                           + FUSED_H * FUSED_O),
        transcendentals=n_pad * (FUSED_H + 2 * FUSED_O),
        bytes_accessed=n_pad * D_MODEL * 4 + n_pad * FUSED_O * 4 + weight_bytes,
    )

    packed_t = pl.pallas_call(
        defect_classifier_kernel,
        out_shape=jax.ShapeDtypeStruct((FUSED_O, n_pad), jnp.float32),
        grid_spec=pltpu.PrefetchScalarGridSpec(
            num_scalar_prefetch=0,
            grid=grid,
            in_specs=[
                pl.BlockSpec((tm, D_MODEL), lambda i: (i, 0)),      # x tile
                pl.BlockSpec((D_MODEL, FUSED_H), const),            # W1 (fused)
                pl.BlockSpec((D_MODEL, FUSED_H), const),            # M (LN stats)
                pl.BlockSpec((8, FUSED_H), const),                  # b1/gamma/beta/b2 slab
                pl.BlockSpec((FUSED_H, FUSED_O), const),            # W2 (block-diag)
            ],
            out_specs=pl.BlockSpec((FUSED_O, tm), lambda i: (0, i)),  # lane-dense
        ),
        compiler_params=pltpu.CompilerParams(
            dimension_semantics=("parallel",),
            vmem_limit_bytes=32 * 1024 * 1024,
        ),
        cost_estimate=cost,
    )(x2d, w1, m_avg, slab, w2)

    packed_t = packed_t[:, :N]                                         # [4, N]
    logits = packed_t[:N_OUT, :].T.reshape(B, S, N_OUT)
    uncertainty = packed_t[N_OUT:, :].T.reshape(B, S, N_OUT)
    return logits, uncertainty


def init_params(key):
    """Deterministic parameter init (PyTorch-style uniform(-1/sqrt(in), 1/sqrt(in)))."""
    keys = jax.random.split(key, 8)

    def lin(kw, kb, fan_in, fan_out):
        bound = 1.0 / jnp.sqrt(jnp.float32(fan_in))
        w = jax.random.uniform(kw, (fan_in, fan_out), jnp.float32, -bound, bound)
        b = jax.random.uniform(kb, (1, fan_out), jnp.float32, -bound, bound)
        return w, b

    w1c, b1c = lin(keys[0], keys[1], D_MODEL, HIDDEN)
    w2c, b2c = lin(keys[2], keys[3], HIDDEN, N_OUT)
    w1u, b1u = lin(keys[4], keys[5], D_MODEL, HIDDEN)
    w2u, b2u = lin(keys[6], keys[7], HIDDEN, N_OUT)

    return {
        "w1c": w1c, "b1c": b1c,
        "gc": jnp.ones((1, HIDDEN), jnp.float32),
        "bc": jnp.zeros((1, HIDDEN), jnp.float32),
        "w2c": w2c, "b2c": b2c,
        "w1u": w1u, "b1u": b1u,
        "gu": jnp.ones((1, HIDDEN), jnp.float32),
        "bu": jnp.zeros((1, HIDDEN), jnp.float32),
        "w2u": w2u, "b2u": b2u,
    }


def reference_forward(x, params):
    """Plain-JAX reference (eval-mode PyTorch semantics)."""
    def branch(x2, w1, b1, g, bt, w2, b2):
        h = x2 @ w1 + b1
        mu = h.mean(-1, keepdims=True)
        var = ((h - mu) ** 2).mean(-1, keepdims=True)
        hn = (h - mu) / jnp.sqrt(var + LN_EPS) * g + bt
        hn = jnp.maximum(hn, 0.0)
        return hn @ w2 + b2

    logits = branch(x, params["w1c"], params["b1c"], params["gc"], params["bc"],
                    params["w2c"], params["b2c"])
    u = branch(x, params["w1u"], params["b1u"], params["gu"], params["bu"],
               params["w2u"], params["b2u"])
    unc = jax.nn.softplus(u) + 1e-6
    return logits, unc


if __name__ == "__main__":
    key = jax.random.PRNGKey(0)
    k_x, k_p, k_x2 = jax.random.split(key, 3)
    params = init_params(k_p)

    # Tolerance 1e-3: the MXU-based LayerNorm statistics introduce matmul
    # rounding that differs slightly from the VPU-reduction reference.
    TOL = 1e-3

    # Small canonical shape (single grid step, block == full array).
    B, S = 2, 8
    x = jax.random.normal(k_x, (B, S, D_MODEL), jnp.float32)
    logits, uncertainty = defect_classifier_forward(x, params)
    jax.block_until_ready((logits, uncertainty))

    ref_logits, ref_unc = reference_forward(x, params)
    assert logits.shape == (B, S, 2) and uncertainty.shape == (B, S, 2)
    assert jnp.allclose(logits, ref_logits, atol=TOL, rtol=TOL)
    assert jnp.allclose(uncertainty, ref_unc, atol=TOL, rtol=TOL)
    assert bool(jnp.all(uncertainty > 0))

    # Larger shape exercising the multi-step grid + lane-dense transposed output.
    B2, S2 = 4, 256
    x2 = jax.random.normal(k_x2, (B2, S2, D_MODEL), jnp.float32)
    logits2, unc2 = defect_classifier_forward(x2, params)
    jax.block_until_ready((logits2, unc2))

    ref_logits2, ref_unc2 = reference_forward(x2, params)
    assert jnp.allclose(logits2, ref_logits2, atol=TOL, rtol=TOL)
    assert jnp.allclose(unc2, ref_unc2, atol=TOL, rtol=TOL)
    assert bool(jnp.all(unc2 > 0))

    print("KERNEL_OK")
</pallas_src>

<mosaic_0001>
module attributes {stable_mosaic.version = 11 : i64} {
  func.func @defect_classifier_kernel(%arg0: i32, %arg1: memref<16x128xf32, #tpu.memory_space<vmem>>, %arg2: memref<128x128xf32, #tpu.memory_space<vmem>>, %arg3: memref<128x128xf32, #tpu.memory_space<vmem>>, %arg4: memref<8x128xf32, #tpu.memory_space<vmem>>, %arg5: memref<128x4xf32, #tpu.memory_space<vmem>>, %arg6: memref<4x16xf32, #tpu.memory_space<vmem>>) attributes {dimension_semantics = [#tpu.dimension_semantics<parallel>], iteration_bounds = array<i64: 1>, scalar_prefetch = 0 : i64, scratch_operands = 0 : i64, tpu.core_type = #tpu.core_type<tc>, window_params = [{transform_indices = @transform_0, window_bounds = array<i64: 16, 128>}, {pipeline_mode = #tpu.pipeline_mode<synchronous>, transform_indices = @transform_1, window_bounds = array<i64: 128, 128>}, {pipeline_mode = #tpu.pipeline_mode<synchronous>, transform_indices = @transform_2, window_bounds = array<i64: 128, 128>}, {pipeline_mode = #tpu.pipeline_mode<synchronous>, transform_indices = @transform_3, window_bounds = array<i64: 8, 128>}, {pipeline_mode = #tpu.pipeline_mode<synchronous>, transform_indices = @transform_4, window_bounds = array<i64: 128, 4>}, {transform_indices = @transform_5, window_bounds = array<i64: 4, 16>}]} {
    %c0 = arith.constant 0 : index
    %c0_0 = arith.constant 0 : index
    %0 = vector.load %arg1[%c0, %c0_0] : memref<16x128xf32, #tpu.memory_space<vmem>>, vector<16x128xf32>
    %c0_1 = arith.constant 0 : index
    %c0_2 = arith.constant 0 : index
    %1 = vector.load %arg4[%c0_1, %c0_2] : memref<8x128xf32, #tpu.memory_space<vmem>>, vector<8x128xf32>
    %2 = vector.extract_strided_slice %1 {offsets = [0, 0], sizes = [1, 128], strides = [1, 1]} : vector<8x128xf32> to vector<1x128xf32>
    %3 = vector.extract_strided_slice %1 {offsets = [1, 0], sizes = [1, 128], strides = [1, 1]} : vector<8x128xf32> to vector<1x128xf32>
    %4 = vector.extract_strided_slice %1 {offsets = [2, 0], sizes = [1, 128], strides = [1, 1]} : vector<8x128xf32> to vector<1x128xf32>
    %5 = vector.extract_strided_slice %1 {offsets = [3, 0], sizes = [4, 1], strides = [1, 1]} : vector<8x128xf32> to vector<4x1xf32>
    %c0_3 = arith.constant 0 : index
    %c0_4 = arith.constant 0 : index
    %6 = vector.load %arg2[%c0_3, %c0_4] : memref<128x128xf32, #tpu.memory_space<vmem>>, vector<128x128xf32>
    %cst = arith.constant dense<0.000000e+00> : vector<16x128xf32>
    %7 = tpu.matmul %0, %6, %cst {dimension_numbers = #tpu.dot_dimension_numbers<[1], [0], [0], [1], [0, 0, 1, 1], [], []>} : vector<16x128xf32>, vector<128x128xf32>, vector<16x128xf32> -> vector<16x128xf32>
    %8 = vector.broadcast %2 : vector<1x128xf32> to vector<16x128xf32>
    %9 = arith.addf %7, %8 : vector<16x128xf32>
    %c0_5 = arith.constant 0 : index
    %c0_6 = arith.constant 0 : index
    %10 = vector.load %arg3[%c0_5, %c0_6] : memref<128x128xf32, #tpu.memory_space<vmem>>, vector<128x128xf32>
    %cst_7 = arith.constant dense<0.000000e+00> : vector<16x128xf32>
    %11 = tpu.matmul %9, %10, %cst_7 {dimension_numbers = #tpu.dot_dimension_numbers<[1], [0], [0], [1], [0, 0, 1, 1], [], []>} : vector<16x128xf32>, vector<128x128xf32>, vector<16x128xf32> -> vector<16x128xf32>
    %12 = arith.subf %9, %11 : vector<16x128xf32>
    %13 = arith.mulf %12, %12 : vector<16x128xf32>
    %c0_8 = arith.constant 0 : index
    %c0_9 = arith.constant 0 : index
    %14 = vector.load %arg3[%c0_8, %c0_9] : memref<128x128xf32, #tpu.memory_space<vmem>>, vector<128x128xf32>
    %cst_10 = arith.constant dense<0.000000e+00> : vector<16x128xf32>
    %15 = tpu.matmul %13, %14, %cst_10 {dimension_numbers = #tpu.dot_dimension_numbers<[1], [0], [0], [1], [0, 0, 1, 1], [], []>} : vector<16x128xf32>, vector<128x128xf32>, vector<16x128xf32> -> vector<16x128xf32>
    %cst_11 = arith.constant 9.99999974E-6 : f32
    %16 = vector.broadcast %cst_11 : f32 to vector<16x128xf32>
    %17 = arith.addf %15, %16 : vector<16x128xf32>
    %18 = math.rsqrt %17 : vector<16x128xf32>
    %19 = arith.mulf %12, %18 : vector<16x128xf32>
    %20 = vector.broadcast %3 : vector<1x128xf32> to vector<16x128xf32>
    %21 = arith.mulf %19, %20 : vector<16x128xf32>
    %22 = vector.broadcast %4 : vector<1x128xf32> to vector<16x128xf32>
    %23 = arith.addf %21, %22 : vector<16x128xf32>
    %cst_12 = arith.constant 0.000000e+00 : f32
    %24 = vector.broadcast %cst_12 : f32 to vector<16x128xf32>
    %25 = arith.maximumf %23, %24 : vector<16x128xf32>
    %c0_13 = arith.constant 0 : index
    %c0_14 = arith.constant 0 : index
    %26 = vector.load %arg5[%c0_13, %c0_14] : memref<128x4xf32, #tpu.memory_space<vmem>>, vector<128x4xf32>
    %cst_15 = arith.constant dense<0.000000e+00> : vector<16x4xf32>
    %27 = tpu.matmul %25, %26, %cst_15 {dimension_numbers = #tpu.dot_dimension_numbers<[1], [0], [0], [1], [0, 0, 1, 1], [], []>} : vector<16x128xf32>, vector<128x4xf32>, vector<16x4xf32> -> vector<16x4xf32>
    %28 = tpu.transpose %27, [1, 0] : vector<16x4xf32> -> vector<4x16xf32>
    %29 = vector.broadcast %5 : vector<4x1xf32> to vector<4x16xf32>
    %30 = arith.addf %28, %29 : vector<4x16xf32>
    %31 = tpu.iota {dimensions = array<i32: 0>} : vector<4x1xi32>
    %cst_16 = arith.constant 0.000000e+00 : f32
    %32 = vector.broadcast %cst_16 : f32 to vector<4x16xf32>
    %33 = arith.maximumf %30, %32 : vector<4x16xf32>
    %34 = math.absf %30 : vector<4x16xf32>
    %cst_17 = arith.constant 0.000000e+00 : f32
    %35 = vector.broadcast %cst_17 : f32 to vector<4x16xf32>
    %36 = arith.subf %35, %34 : vector<4x16xf32>
    %37 = math.exp %36 : vector<4x16xf32>
    %38 = math.log1p %37 : vector<4x16xf32>
    %39 = arith.addf %33, %38 : vector<4x16xf32>
    %c2_i32 = arith.constant 2 : i32
    %40 = vector.broadcast %c2_i32 : i32 to vector<4x1xi32>
    %41 = arith.cmpi sge, %31, %40 : vector<4x1xi32>
    %cst_18 = arith.constant 9.99999997E-7 : f32
    %42 = vector.broadcast %cst_18 : f32 to vector<4x16xf32>
    %43 = arith.addf %39, %42 : vector<4x16xf32>
    %44 = vector.shape_cast %41 : vector<4x1xi1> to vector<4x1xi1>
    %45 = vector.broadcast %44 : vector<4x1xi1> to vector<4x16xi1>
    %46 = arith.select %45, %43, %30 : vector<4x16xi1>, vector<4x16xf32>
    %c0_19 = arith.constant 0 : index
    %c0_20 = arith.constant 0 : index
    %47 = vector.load %arg6[%c0_19, %c0_20] : memref<4x16xf32, #tpu.memory_space<vmem>>, vector<4x16xf32>
    tpu.vector_store %arg6[%c0_19, %c0_20], %46 {strides = array<i32>} : memref<4x16xf32, #tpu.memory_space<vmem>>, vector<4x16xf32>,
    return
  }
  func.func @transform_0(%arg0: i32) -> (i32, i32) {
    %c0_i32 = arith.constant 0 : i32
    %c0_i32_0 = arith.constant 0 : i32
    return %arg0, %c0_i32 : i32, i32
  }
  func.func @transform_1(%arg0: i32) -> (i32, i32) {
    %c0_i32 = arith.constant 0 : i32
    %c0_i32_0 = arith.constant 0 : i32
    %c0_i32_1 = arith.constant 0 : i32
    return %c0_i32, %c0_i32_0 : i32, i32
  }
  func.func @transform_2(%arg0: i32) -> (i32, i32) {
    %c0_i32 = arith.constant 0 : i32
    %c0_i32_0 = arith.constant 0 : i32
    %c0_i32_1 = arith.constant 0 : i32
    return %c0_i32, %c0_i32_0 : i32, i32
  }
  func.func @transform_3(%arg0: i32) -> (i32, i32) {
    %c0_i32 = arith.constant 0 : i32
    %c0_i32_0 = arith.constant 0 : i32
    %c0_i32_1 = arith.constant 0 : i32
    return %c0_i32, %c0_i32_0 : i32, i32
  }
  func.func @transform_4(%arg0: i32) -> (i32, i32) {
    %c0_i32 = arith.constant 0 : i32
    %c0_i32_0 = arith.constant 0 : i32
    %c0_i32_1 = arith.constant 0 : i32
    return %c0_i32, %c0_i32_0 : i32, i32
  }
  func.func @transform_5(%arg0: i32) -> (i32, i32) {
    %c0_i32 = arith.constant 0 : i32
    %c0_i32_0 = arith.constant 0 : i32
    return %c0_i32, %arg0 : i32, i32
  }
}

</mosaic_0001>

<bundles_post_ra>
// kernel: tpu_custom_call.1
= control target key start
LH: loop header
LB: loop body
LE: loop exit
PB: predicated region body
PF: predicated region fallthrough
CT: control target
= control target key end

     0   :  { %10 = vsyncpa [#allocation3], 0  ;;  %s600_s0 = inlined_call_operand.hbm [shape: f32[16,128], index: 0, kind: input, shape index: {}]   ;;  %s601_s1 = inlined_call_operand.vmem [shape: f32[128,128], index: 1, kind: input, shape index: {}]   ;;  %s602_s2 = inlined_call_operand.hbm [shape: f32[128,128], index: 2, kind: input, shape index: {}]   ;;  %s603_s3 = inlined_call_operand.hbm [shape: f32[8,128], index: 3, kind: input, shape index: {}]   ;;  %s604_s4 = inlined_call_operand.vmem [shape: f32[128,4], index: 4, kind: input, shape index: {}]   ;;  %s605_s5 = inlined_call_operand.hbm [shape: f32[4,16], index: 5, kind: output, shape index: {}]  }
   0x1   :  { %11 = vsyncpa [#allocation6], 0 }
   0x2   :  { %12 = vsyncpa [#allocation4], 0  ;;  %s32_s20 = sshll.u32 %s602_s2, 4  ;;  %s444_s21 = smov [#allocation5]   ;;  %s33_s20 = int_to_ptr.hbm [resolvable:$true] %s32_s20 }
   0x3   :  { %s34_s22 = sshll.u32 %s444_s21, 4  ;;  %s17_s25 = sshll.u32 %s600_s0, 4  ;;  %s35_s22 = int_to_ptr.vmem [resolvable:$true] %s34_s22  ;;  %s18_s25 = int_to_ptr.hbm [resolvable:$true] %s17_s25 }
   0x4   :  { %s445_s26 = smov 128   ;;  %s446_s27 = smov 8  }
   0x5   :  { %40 = dma.hbm_to_vmem [thread:$0]  %s33_s20, 2048, %s35_s22, [#allocation6], %s445_s26, %s445_s26, %s446_s27  }
   0x6   :  { %s447_s28 = smov [#allocation2]   ;;  %s46_s7 = sshll.u32 %s603_s3, 4  ;;  %s47_s7 = int_to_ptr.hbm [resolvable:$true] %s46_s7 }
   0x7   :  { %s19_s29 = sshll.u32 %s447_s28, 4  ;;  %s448_s2 = smov [#allocation7]   ;;  %s20_s29 = int_to_ptr.vmem [resolvable:$true] %s19_s29 }
   0x8   :  { %25 = dma.hbm_to_vmem [thread:$0]  %s18_s25, 256, %s20_s29, [#allocation3], %s445_s26, %s445_s26, %s446_s27  }
   0x9   :  { %s48_s8 = sshll.u32 %s448_s2, 4  ;;  %s49_s8 = int_to_ptr.vmem [resolvable:$true] %s48_s8 }
   0xa   :  { %51 = dma.hbm_to_vmem [thread:$0]  %s47_s7, 128, %s49_s8, [#allocation6]  }
   0xb   :  { %438 = dma.done.wait [#allocation3], 256  }
   0xc   :  { %439 = vsyncadd [#allocation3], 4294967040 }
   0xd   :  { %440 = dma.done.wait [#allocation6], 2176  }
   0xe   :  { %441 = vsyncadd [#allocation6], 4294965120  ;;  %v84_v0 = vld [vmem:[%s601_s1 + $0x78] sm:$0xff]  ;;  %v83_v1 = vld [vmem:[%s601_s1 + $0x70] sm:$0xff]  ;;  %s314_s16 = sshll.u32 %s605_s5, 4  ;;  %vm305_vm8 = vcmask 125952   ;;  %s315_s16 = int_to_ptr.hbm [resolvable:$true] %s314_s16 }
   0xf   :  { %86 = vmatpush.msra.mxu0 %v84_v0  ;;  %v82_v2 = vld [vmem:[%s601_s1 + $0x68] sm:$0xff]  ;;  %v81_v3 = vld [vmem:[%s601_s1 + $0x60] sm:$0xff]  ;;  %v80_v4 = vld [vmem:[%s601_s1 + $0x58] sm:$0xff]  ;;  %v449_v0 = vmov 0  }
  0x10   :  { %v79_v5 = vld [vmem:[%s601_s1 + $0x50] sm:$0xff]  ;;  %v124_v6 = vld [vmem:[#allocation5 + $0x78] sm:$0xff]  ;;  %v123_v7 = vld [vmem:[#allocation5 + $0x70] sm:$0xff]  ;;  %333 = vset.pattern.permute.xlu0 %v449_v0 }
  0x11   :  { %87 = vmatpush.msra.mxu0 %v83_v1  ;;  %125 = vmatpush.msra.mxu1 %v124_v6  ;;  %v78_v8 = vld [vmem:[%s601_s1 + $0x48] sm:$0xff]  ;;  %v122_v9 = vld [vmem:[#allocation5 + $0x68] sm:$0xff]  ;;  %v77_v10 = vld [vmem:[%s601_s1 + $0x40] sm:$0xff] }
  0x12   :  { %152 = vmatpush.msra.mxu2 %v124_v6  ;;  %v121_v11 = vld [vmem:[#allocation5 + $0x60] sm:$0xff]  ;;  %v76_v12 = vld [vmem:[%s601_s1 + $0x38] sm:$0xff]  ;;  %v120_v13 = vld [vmem:[#allocation5 + $0x58] sm:$0xff] }
  0x13   :  { %88 = vmatpush.msra.mxu0 %v82_v2  ;;  %126 = vmatpush.msra.mxu1 %v123_v7  ;;  %v75_v14 = vld [vmem:[%s601_s1 + $0x30] sm:$0xff]  ;;  %v119_v15 = vld [vmem:[#allocation5 + $0x50] sm:$0xff]  ;;  %v74_v16 = vld [vmem:[%s601_s1 + $0x28] sm:$0xff] }
  0x14   :  { %153 = vmatpush.msra.mxu2 %v123_v7  ;;  %v118_v17 = vld [vmem:[#allocation5 + $0x48] sm:$0xff]  ;;  %v73_v18 = vld [vmem:[%s601_s1 + $0x20] sm:$0xff]  ;;  %v117_v19 = vld [vmem:[#allocation5 + $0x40] sm:$0xff] }
  0x15   :  { %89 = vmatpush.msra.mxu0 %v81_v3  ;;  %127 = vmatpush.msra.mxu1 %v122_v9  ;;  %v72_v20 = vld [vmem:[%s601_s1 + $0x18] sm:$0xff]  ;;  %v116_v21 = vld [vmem:[#allocation5 + $0x38] sm:$0xff]  ;;  %v71_v22 = vld [vmem:[%s601_s1 + $0x10] sm:$0xff] }
  0x16   :  { %154 = vmatpush.msra.mxu2 %v122_v9  ;;  %v115_v23 = vld [vmem:[#allocation5 + $0x30] sm:$0xff]  ;;  %v70_v24 = vld [vmem:[%s601_s1 + $0x8] sm:$0xff]  ;;  %v114_v25 = vld [vmem:[#allocation5 + $0x28] sm:$0xff] }
  0x17   :  { %90 = vmatpush.msra.mxu0 %v80_v4  ;;  %128 = vmatpush.msra.mxu1 %v121_v11  ;;  %v69_v26 = vld [vmem:[%s601_s1] sm:$0xff]  ;;  %v113_v27 = vld [vmem:[#allocation5 + $0x20] sm:$0xff]  ;;  %v112_v29 = vld [vmem:[#allocation5 + $0x18] sm:$0xff] }
  0x18   :  { %155 = vmatpush.msra.mxu2 %v121_v11  ;;  %v66_v28 = vld [vmem:[#allocation2] sm:$0xff]  ;;  %v67_v31 = vld [vmem:[#allocation2 + $0x8] sm:$0xff]  ;;  %v110_v32 = vld [vmem:[#allocation5 + $0x8] sm:$0xff] }
  0x19   :  { %91 = vmatpush.msra.mxu0 %v79_v5  ;;  %129 = vmatpush.msra.mxu1 %v120_v13  ;;  %v111_v30 = vld [vmem:[#allocation5 + $0x10] sm:$0xff]  ;;  %v109_v33 = vld [vmem:[#allocation5] sm:$0xff]  ;;  %v220_v40 = vld [vmem:[%s604_s4 + $0x78] sm:$0xff] }
  0x1a   :  { %156 = vmatpush.msra.mxu2 %v120_v13  ;;  %v538_v34 = vld [vmem:[#allocation7] sm:$0xff]  ;;  %221 = vmatpush.msra.mxu3 %v220_v40  ;;  %v218_v48 = vld [vmem:[%s604_s4 + $0x68] sm:$0xff]  ;;  %v217_v49 = vld [vmem:[%s604_s4 + $0x60] sm:$0xff] }
  0x1b   :  { %92 = vmatpush.msra.mxu0 %v78_v8  ;;  %130 = vmatpush.msra.mxu1 %v119_v15  ;;  %v85_v35 = vperm.slane %v538_v34, 0  ;;  %v219_v47 = vld [vmem:[%s604_s4 + $0x70] sm:$0xff]  ;;  %v216_v50 = vld [vmem:[%s604_s4 + $0x58] sm:$0xff]  ;;  %v214_v52 = vld [vmem:[%s604_s4 + $0x48] sm:$0xff]  ;;  %v197_v11 = vperm.slane %v538_v34, 1 }
  0x1c   :  { %157 = vmatpush.msra.mxu2 %v119_v15  ;;  %222 = vmatpush.msra.mxu3 %v219_v47  ;;  %v215_v51 = vld [vmem:[%s604_s4 + $0x50] sm:$0xff]  ;;  %v213_v53 = vld [vmem:[%s604_s4 + $0x40] sm:$0xff]  ;;  %v212_v54 = vld [vmem:[%s604_s4 + $0x38] sm:$0xff]  ;;  %v200_v15 = vperm.slane %v538_v34, 2 }
  0x1d   :  { %93 = vmatpush.msra.mxu0 %v77_v10  ;;  %131 = vmatpush.msra.mxu1 %v118_v17  ;;  %v211_v55 = vld [vmem:[%s604_s4 + $0x30] sm:$0xff]  ;;  %v210_v56 = vld [vmem:[%s604_s4 + $0x28] sm:$0xff]  ;;  %v209_v57 = vld [vmem:[%s604_s4 + $0x20] sm:$0xff] }
  0x1e   :  { %158 = vmatpush.msra.mxu2 %v118_v17  ;;  %223 = vmatpush.msra.mxu3 %v218_v48  ;;  %v208_v58 = vld [vmem:[%s604_s4 + $0x18] sm:$0xff]  ;;  %v207_v59 = vld [vmem:[%s604_s4 + $0x10] sm:$0xff]  ;;  %v206_v60 = vld [vmem:[%s604_s4 + $0x8] sm:$0xff] }
  0x1f   :  { %94 = vmatpush.msra.mxu0 %v76_v12  ;;  %132 = vmatpush.msra.mxu1 %v117_v19  ;;  %v205_v61 = vld [vmem:[%s604_s4] sm:$0xff]  ;;  %s450_s4 = smov [#allocation8]  }
  0x20   :  { %159 = vmatpush.msra.mxu2 %v117_v19  ;;  %224 = vmatpush.msra.mxu3 %v217_v49  ;;  %s312_s13 = sshll.u32 %s450_s4, 4  ;;  %s313_s13 = int_to_ptr.vmem [resolvable:$true] %s312_s13 }
  0x21   :  { %95 = vmatpush.msra.mxu0 %v75_v14  ;;  %133 = vmatpush.msra.mxu1 %v116_v21 }
  0x22   :  { %160 = vmatpush.msra.mxu2 %v116_v21  ;;  %225 = vmatpush.msra.mxu3 %v216_v50 }
  0x23   :  { %96 = vmatpush.msra.mxu0 %v74_v16  ;;  %134 = vmatpush.msra.mxu1 %v115_v23 }
  0x24   :  { %161 = vmatpush.msra.mxu2 %v115_v23  ;;  %226 = vmatpush.msra.mxu3 %v215_v51 }
  0x25   :  { %97 = vmatpush.msra.mxu0 %v73_v18  ;;  %135 = vmatpush.msra.mxu1 %v114_v25 }
  0x26   :  { %162 = vmatpush.msra.mxu2 %v114_v25  ;;  %227 = vmatpush.msra.mxu3 %v214_v52 }
  0x27   :  { %98 = vmatpush.msra.mxu0 %v72_v20  ;;  %136 = vmatpush.msra.mxu1 %v113_v27 }
  0x28   :  { %163 = vmatpush.msra.mxu2 %v113_v27  ;;  %228 = vmatpush.msra.mxu3 %v213_v53 }
  0x29   :  { %99 = vmatpush.msra.mxu0 %v71_v22  ;;  %137 = vmatpush.msra.mxu1 %v112_v29 }
  0x2a   :  { %164 = vmatpush.msra.mxu2 %v112_v29  ;;  %229 = vmatpush.msra.mxu3 %v212_v54 }
  0x2b   :  { %100 = vmatpush.msra.mxu0 %v70_v24  ;;  %138 = vmatpush.msra.mxu1 %v111_v30 }
  0x2c   :  { %165 = vmatpush.msra.mxu2 %v111_v30  ;;  %230 = vmatpush.msra.mxu3 %v211_v55 }
  0x2d   :  { %101 = vmatpush.msra.mxu0 %v69_v26  ;;  %139 = vmatpush.msra.mxu1 %v110_v32 }
  0x2e   :  { %102 = vmatmul.f32.vlgmr.msra.gmra.mxu0 %v66_v28  ;;  %166 = vmatpush.msra.mxu2 %v110_v32 }
  0x2f   :  { %140 = vmatpush.msra.mxu1 %v109_v33  ;;  %231 = vmatpush.msra.mxu3 %v210_v56 }
  0x30   :  { %167 = vmatpush.msra.mxu2 %v109_v33  ;;  %278 = vperm.xlu0 %333, %v538_v34  }
  0x31   :  { %232 = vmatpush.msra.mxu3 %v209_v57 }
  0x33   :  { %233 = vmatpush.msra.mxu3 %v208_v58 }
  0x35   :  { %234 = vmatpush.msra.mxu3 %v207_v59 }
  0x36   :  { %105 = vmatmul.f32.gmra.mxu0 %v67_v31 }
  0x37   :  { %235 = vmatpush.msra.mxu3 %v206_v60 }
  0x39   :  { %236 = vmatpush.msra.mxu3 %v205_v61 }
  0xa2   :  { %v279_v29 = vpop.permute.xlu0 %278 }
  0xa3   :  { %v280_v30 = vrot.slane %v279_v29, 3 }
  0xab   :  { %v103_v36 = vpop.f32.mrf.mxu0 }
  0xac   :  { %v104_v37 = vadd.f32 %v103_v36, %v85_v35 }
  0xae   :  { %141 = vmatmul.f32.vlgmr.msra.gmra.mxu1 %v104_v37 }
  0xb3   :  { %v106_v38 = vpop.f32.mrf.mxu0 }
  0xb4   :  { %v107_v39 = vadd.f32 %v106_v38, %v85_v35 }
  0xb6   :  { %144 = vmatmul.f32.gmra.mxu1 %v107_v39 }
 0x12b   :  { %v142_v41 = vpop.f32.mrf.mxu1 }
 0x12c   :  { %v148_v42 = vsub.f32 %v104_v37, %v142_v41 }
 0x12e   :  { %v150_v43 = vmul.f32 %v148_v42, %v148_v42 }
 0x130   :  { %168 = vmatmul.f32.vlgmr.msra.gmra.mxu2 %v150_v43 }
 0x133   :  { %v145_v44 = vpop.f32.mrf.mxu1 }
 0x134   :  { %v544_v45 = vsub.f32 %v107_v39, %v145_v44  ;;  %v283_v39 = vlaneseq }
 0x136   :  { %v151_v46 = vmul.f32 %v544_v45, %v544_v45  ;;  %v284_v43 = vshrl.u32 %v283_v39, 7 }
 0x138   :  { %171 = vmatmul.f32.gmra.mxu2 %v151_v46  ;;  %vm300_vm7 = vcmp.ge.s32.totalorder %v284_v43, 2 }
 0x1b3   :  { %v169_v62 = vpop.f32.mrf.mxu2 }
 0x1b4   :  { %v170_v63 = vadd.f32 1e-05, %v169_v62 }
 0x1b6   :  { %334 = vrsqrt.f32 %v170_v63  ;;  %vm181_vm1 = vweird.f32 %v170_v63 }
 0x1bb   :  { %v172_v1 = vpop.f32.mrf.mxu2 }
 0x1bc   :  { %v335_v2 = vpop.eup %334  ;;  %v173_v3 = vadd.f32 1e-05, %v172_v1 }
 0x1bd   :  { %v176_v4 = vmul.f32 %v335_v2, %v170_v63  ;;  %vm182_vm0 = vweird.f32 %v335_v2 }
 0x1be   :  { %336 = vrsqrt.f32 %v173_v3  ;;  %vm183_vm2 = vmor %vm181_vm1, %vm182_vm0  ;;  %vm191_vm4 = vweird.f32 %v173_v3 }
 0x1bf   :  { %v177_v5 = vmul.f32 %v335_v2, %v176_v4 }
 0x1c1   :  { %v178_v6 = vmul.f32 0.5, %v177_v5 }
 0x1c3   :  { %v179_v7 = vsub.f32 1.5, %v178_v6 }
 0x1c4   :  { %v337_v8 = vpop.eup %336 }
 0x1c5   :  { %v180_v9 = vmul.f32 %v335_v2, %v179_v7  ;;  %v186_v10 = vmul.f32 %v337_v8, %v173_v3  ;;  %vm192_vm3 = vweird.f32 %v337_v8 }
 0x1c6   :  { %vm193_vm5 = vmor %vm191_vm4, %vm192_vm3 }
 0x1c7   :  { %v187_v12 = vmul.f32 %v337_v8, %v186_v10  ;;  %v184_v13 = vsel %vm183_vm2, %v335_v2, %v180_v9 }
 0x1c8   :  { %v195_v14 = vmul.f32 %v184_v13, %v148_v42 }
 0x1c9   :  { %v188_v16 = vmul.f32 0.5, %v187_v12 }
 0x1ca   :  { %v198_v17 = vmul.f32 %v197_v11, %v195_v14 }
 0x1cb   :  { %v189_v18 = vsub.f32 1.5, %v188_v16 }
 0x1cc   :  { %v201_v19 = vadd.f32 %v200_v15, %v198_v17 }
 0x1cd   :  { %v190_v20 = vmul.f32 %v337_v8, %v189_v18 }
 0x1ce   :  { %v203_v21 = vmax.f32 %v201_v19, 0.0 }
 0x1cf   :  { %v194_v22 = vsel %vm193_vm5, %v337_v8, %v190_v20 }
 0x1d0   :  { %237 = vmatmul.f32.vlgmr.msra.gmra.mxu3 %v203_v21  ;;  %v196_v23 = vmul.f32 %v194_v22, %v544_v45 }
 0x1d2   :  { %v199_v24 = vmul.f32 %v197_v11, %v196_v23 }
 0x1d4   :  { %v202_v25 = vadd.f32 %v200_v15, %v199_v24 }
 0x1d6   :  { %v204_v26 = vmax.f32 %v202_v25, 0.0 }
 0x1d8   :  { %240 = vmatmul.f32.gmra.mxu3 %v204_v26 }
 0x253   :  { %v238_v27 = vpop.f32.mrf.mxu3 }
 0x254   :  { %244 = vxpose.xlu0.b32.start [1/2] (short) (narrow) %v238_v27, 8 }
 0x25b   :  { %v241_v28 = vpop.f32.mrf.mxu3 }
 0x25c   :  { %245 = vxpose.xlu0.b32.end [2/2] (short) (narrow) %v241_v28, 8 }
 0x2f8   :  { %v260_v31 = vpop.trf.xlu0 }
 0x2f9   :  { %v282_v32 = vadd.f32 %v280_v30, %v260_v31 }
 0x2fb   :  { %v286_v33 = vand.u32 2147483647, %v282_v32  ;;  %v285_v46 = vmax.f32 %v282_v32, 0.0 }
 0x2fd   :  { %v287_v34 = vsub.f32 0.0, %v286_v33 }
 0x2ff   :  { %v288_v35 = vmul.f32 1.442695, %v287_v34 }
 0x301   :  { %338 = vpow2.f32 %v288_v35 }
 0x307   :  { %v339_v36 = vpop.eup %338 }
 0x308   :  { %v290_v37 = vadd.f32 1.0, %v339_v36  ;;  %v293_v38 = vmul.f32 -0.5, %v339_v36  ;;  %v296_v41 = vand.u32 2147483647, %v339_v36 }
 0x30a   :  { %340 = vlog2.f32 %v290_v37  ;;  %v294_v40 = vadd.f32 1.0, %v293_v38  ;;  %vm297_vm6 = vcmp.lt.f32.partialorder %v296_v41, 0.0004427343 }
 0x30c   :  { %v295_v45 = vmul.f32 %v339_v36, %v294_v40 }
 0x310   :  { %v341_v42 = vpop.eup %340 }
 0x311   :  { %v292_v44 = vmul.f32 0.6931472, %v341_v42 }
 0x313   :  { %v298_v47 = vsel %vm297_vm6, %v295_v45, %v292_v44 }
 0x314   :  { %v299_v48 = vadd.f32 %v298_v47, %v285_v46 }
 0x316   :  { %v301_v49 = vadd.f32 1e-06, %v299_v48 }
 0x318   :  { %v304_v50 = vsel %vm300_vm7, %v301_v49, %v282_v32 }
 0x319   :  { %306 = vst.msk [vmem:[#allocation8] sm:$0xf] %vm305_vm8, %v304_v50 }
 0x31a   :  { %317 = dma.vmem_to_hbm [thread:$0]  %s313_s13, 64, %s315_s16, [#allocation4]  }
 0x31b   :  { %442 = dma.done.wait [#allocation4], 64  }
 0x31c   :  { %443 = vsyncadd [#allocation4], 4294967232 }
 0x31d   :  { %322 = vsyncpa [#allocation3], 1 }
 0x31e   :  { %323 = vsyncpa [#allocation6], 1 }
 0x31f   :  { %324 = vsyncpa [#allocation4], 1 }

</bundles_post_ra>
